<compile_context>
chip_gen: v7x
topology: tpu7x:2x2x1
jax: 0.10.0
libtpu: 0.0.40
codegen_flags: <defaults>
</compile_context>

<pallas_src>
import functools

import jax
import jax.numpy as jnp
from jax.experimental import pallas as pl
from jax.experimental.pallas import tpu as pltpu

# Original PyTorch layer dims.
D_IN = 5
H1, H2, H3, D_OUT = 143, 169, 89, 3
# Lane-aligned padded dims (multiples of 128 on the lane axis).
H1P, H2P, H3P, D_OUTP = 256, 256, 128, 128


def _round_up(x, m):
    return (x + m - 1) // m * m


def _pad2(a, rows, cols):
    r, c = a.shape
    return jnp.pad(a, ((0, rows - r), (0, cols - c)))


def prepare_params(params, *, dtype=jnp.bfloat16):
    """One-time weight prep (hoisted out of the per-call forward).

    Pads weights/biases to lane-dense 128-multiples and casts the weights to
    `dtype` (bf16 -> native MXU rate).  Biases stay f32 since they are added
    after the f32 accumulation.  Weights are stored transposed as (in, out).
    """
    return {
        "w1": _pad2(params["w1"], D_IN, H1P).astype(dtype),
        "b1": _pad2(params["b1"], 1, H1P).astype(jnp.float32),
        "w2": _pad2(params["w2"], H1P, H2P).astype(dtype),
        "b2": _pad2(params["b2"], 1, H2P).astype(jnp.float32),
        "w3": _pad2(params["w3"], H2P, H3P).astype(dtype),
        "b3": _pad2(params["b3"], 1, H3P).astype(jnp.float32),
        "w4": _pad2(params["w4"], H3P, D_OUTP).astype(dtype),
        "b4": _pad2(params["b4"], 1, D_OUTP).astype(jnp.float32),
    }


def _mlp_kernel(x_ref, w1_ref, b1_ref, w2_ref, b2_ref, w3_ref, b3_ref,
                w4_ref, b4_ref, o_ref):
    """Fused 4-layer MLP (matmul + bias + ReLU chain) for one batch tile.

    Matmul inputs use the weights' dtype (bf16 on the fast path); all
    accumulation, bias-add and ReLU are in f32.
    """
    wdt = w1_ref.dtype
    x = x_ref[...].astype(wdt)
    h = jnp.dot(x, w1_ref[...], preferred_element_type=jnp.float32) + b1_ref[...]
    h = jnp.maximum(h, 0.0)
    h = jnp.dot(h.astype(wdt), w2_ref[...],
                preferred_element_type=jnp.float32) + b2_ref[...]
    h = jnp.maximum(h, 0.0)
    h = jnp.dot(h.astype(wdt), w3_ref[...],
                preferred_element_type=jnp.float32) + b3_ref[...]
    h = jnp.maximum(h, 0.0)
    y = jnp.dot(h.astype(wdt), w4_ref[...],
                preferred_element_type=jnp.float32) + b4_ref[...]
    o_ref[...] = y.astype(o_ref.dtype)


@functools.partial(jax.jit, static_argnames=("block_b",))
def net_forward(x, prepared, *, block_b=4096):
    """x: (B, 5) f32.  prepared: output of prepare_params().  Returns (B, 3) f32."""
    B, Din = x.shape
    assert Din == D_IN

    w1, b1 = prepared["w1"], prepared["b1"]
    w2, b2 = prepared["w2"], prepared["b2"]
    w3, b3 = prepared["w3"], prepared["b3"]
    w4, b4 = prepared["w4"], prepared["b4"]
    # Output in the compute dtype (bf16 halves writeback; final slice is
    # upcast to f32 in the wrapper).
    out_dtype = w1.dtype

    # Batch tiling:
    #  * tile is a multiple of 8 and never larger than the 8-rounded batch;
    #  * at least 2 grid steps whenever possible so the "parallel" batch axis
    #    shards across v7x's two TensorCores (grid=(1,) leaves one TC idle).
    B8 = _round_up(B, 8)
    bb = min(_round_up(block_b, 8), B8)
    if B8 >= 16:
        bb = min(bb, _round_up(B8 // 2, 8))
    Bp = _round_up(B, bb)
    if Bp != B:
        # Padded rows compute on zeros and are sliced off below.
        x = jnp.pad(x, ((0, Bp - B), (0, 0)))
    grid = (Bp // bb,)

    def full_spec(shape):
        # Constant block index across the grid -> each weight is DMA'd once.
        return pl.BlockSpec(shape, lambda i: (0, 0))

    out = pl.pallas_call(
        _mlp_kernel,
        out_shape=jax.ShapeDtypeStruct((Bp, D_OUTP), out_dtype),
        grid_spec=pltpu.PrefetchScalarGridSpec(
            num_scalar_prefetch=0,
            grid=grid,
            in_specs=[
                pl.BlockSpec((bb, D_IN), lambda i: (i, 0)),
                full_spec(w1.shape), full_spec(b1.shape),
                full_spec(w2.shape), full_spec(b2.shape),
                full_spec(w3.shape), full_spec(b3.shape),
                full_spec(w4.shape), full_spec(b4.shape),
            ],
            out_specs=pl.BlockSpec((bb, D_OUTP), lambda i: (i, 0)),
        ),
        compiler_params=pltpu.CompilerParams(
            dimension_semantics=("parallel",),   # batch axis -> megacore on v7x
            # bb=4096 peaks at roughly ~20-25 MiB of VMEM (input lane-padding,
            # double-buffered in/out tiles, f32 intermediates); 48 MiB leaves
            # headroom on v5e/v6e (128 MiB) and stays under v7x's 64 MiB.
            vmem_limit_bytes=48 * 1024 * 1024,
        ),
    )(x, w1, b1, w2, b2, w3, b3, w4, b4)

    # Strip batch padding and the lane padding of the 3-wide output.
    return out[:B, :D_OUT].astype(jnp.float32)


def init_params(key):
    """Deterministic init mimicking PyTorch Linear default (uniform +/- 1/sqrt(fan_in)).
    Weights stored transposed as (in, out); biases as (1, out)."""
    dims = [(D_IN, H1), (H1, H2), (H2, H3), (H3, D_OUT)]
    params = {}
    for idx, (fan_in, fan_out) in enumerate(dims, start=1):
        key, kw, kb = jax.random.split(key, 3)
        bound = 1.0 / jnp.sqrt(float(fan_in))
        params[f"w{idx}"] = jax.random.uniform(
            kw, (fan_in, fan_out), jnp.float32, -bound, bound)
        params[f"b{idx}"] = jax.random.uniform(
            kb, (1, fan_out), jnp.float32, -bound, bound)
    return params


def reference_forward(x, params):
    h = jnp.maximum(x @ params["w1"] + params["b1"], 0.0)
    h = jnp.maximum(h @ params["w2"] + params["b2"], 0.0)
    h = jnp.maximum(h @ params["w3"] + params["b3"], 0.0)
    return h @ params["w4"] + params["b4"]


if __name__ == "__main__":
    key = jax.random.PRNGKey(0)
    key, kx1, kx2, kx3 = jax.random.split(key, 4)
    params = init_params(key)

    prep_f32 = prepare_params(params, dtype=jnp.float32)    # exact path
    prep_bf16 = prepare_params(params, dtype=jnp.bfloat16)  # fast MXU path

    # Case 1: f32 path, B=16 -> bb=8, grid=(2,). Exact-tolerance check.
    B1 = 16
    x1 = jax.random.normal(kx1, (B1, D_IN), jnp.float32)
    out1 = jax.block_until_ready(net_forward(x1, prep_f32))
    ref1 = reference_forward(x1, params)
    assert out1.shape == (B1, D_OUT)
    assert jnp.allclose(out1, ref1, atol=1e-5, rtol=1e-5), "mismatch (f32, B=16)"

    # Case 2: bf16 path, batch not a multiple of the tile (B=13, block_b=8 ->
    # padded to 16, grid=(2,)).  bf16 matmul inputs -> loose tolerance.
    B2 = 13
    x2 = jax.random.normal(kx2, (B2, D_IN), jnp.float32)
    out2 = jax.block_until_ready(net_forward(x2, prep_bf16, block_b=8))
    ref2 = reference_forward(x2, params)
    assert out2.shape == (B2, D_OUT)
    assert jnp.allclose(out2, ref2, atol=1e-1, rtol=1e-1), "mismatch (bf16, B=13)"

    # Case 3: bf16 path with the default tile (clamped to half the batch so
    # grid=(2,) and batch padding are both exercised).
    B3 = 300
    x3 = jax.random.normal(kx3, (B3, D_IN), jnp.float32)
    out3 = jax.block_until_ready(net_forward(x3, prep_bf16))
    ref3 = reference_forward(x3, params)
    assert out3.shape == (B3, D_OUT)
    assert jnp.allclose(out3, ref3, atol=1e-1, rtol=1e-1), "mismatch (bf16, B=300)"

    print("KERNEL_OK")
</pallas_src>

<mosaic_0001>
module attributes {stable_mosaic.version = 11 : i64} {
  func.func @_mlp_kernel(%arg0: i32, %arg1: memref<8x5xf32, #tpu.memory_space<vmem>>, %arg2: memref<5x256xf32, #tpu.memory_space<vmem>>, %arg3: memref<1x256xf32, #tpu.memory_space<vmem>>, %arg4: memref<256x256xf32, #tpu.memory_space<vmem>>, %arg5: memref<1x256xf32, #tpu.memory_space<vmem>>, %arg6: memref<256x128xf32, #tpu.memory_space<vmem>>, %arg7: memref<1x128xf32, #tpu.memory_space<vmem>>, %arg8: memref<128x128xf32, #tpu.memory_space<vmem>>, %arg9: memref<1x128xf32, #tpu.memory_space<vmem>>, %arg10: memref<8x128xf32, #tpu.memory_space<vmem>>) attributes {dimension_semantics = [#tpu.dimension_semantics<parallel>], iteration_bounds = array<i64: 2>, scalar_prefetch = 0 : i64, scratch_operands = 0 : i64, tpu.core_type = #tpu.core_type<tc>, window_params = [{transform_indices = @transform_0, window_bounds = array<i64: 8, 5>}, {pipeline_mode = #tpu.pipeline_mode<synchronous>, transform_indices = @transform_1, window_bounds = array<i64: 5, 256>}, {pipeline_mode = #tpu.pipeline_mode<synchronous>, transform_indices = @transform_2, window_bounds = array<i64: 1, 256>}, {pipeline_mode = #tpu.pipeline_mode<synchronous>, transform_indices = @transform_3, window_bounds = array<i64: 256, 256>}, {pipeline_mode = #tpu.pipeline_mode<synchronous>, transform_indices = @transform_4, window_bounds = array<i64: 1, 256>}, {pipeline_mode = #tpu.pipeline_mode<synchronous>, transform_indices = @transform_5, window_bounds = array<i64: 256, 128>}, {pipeline_mode = #tpu.pipeline_mode<synchronous>, transform_indices = @transform_6, window_bounds = array<i64: 1, 128>}, {pipeline_mode = #tpu.pipeline_mode<synchronous>, transform_indices = @transform_7, window_bounds = array<i64: 128, 128>}, {pipeline_mode = #tpu.pipeline_mode<synchronous>, transform_indices = @transform_8, window_bounds = array<i64: 1, 128>}, {transform_indices = @transform_9, window_bounds = array<i64: 8, 128>}]} {
    %c0 = arith.constant 0 : index
    %c0_0 = arith.constant 0 : index
    %0 = vector.load %arg1[%c0, %c0_0] : memref<8x5xf32, #tpu.memory_space<vmem>>, vector<8x5xf32>
    %c0_1 = arith.constant 0 : index
    %c0_2 = arith.constant 0 : index
    %1 = vector.load %arg2[%c0_1, %c0_2] : memref<5x256xf32, #tpu.memory_space<vmem>>, vector<5x256xf32>
    %cst = arith.constant dense<0.000000e+00> : vector<8x256xf32>
    %2 = tpu.matmul %0, %1, %cst {dimension_numbers = #tpu.dot_dimension_numbers<[1], [0], [0], [1], [0, 0, 1, 1], [], []>} : vector<8x5xf32>, vector<5x256xf32>, vector<8x256xf32> -> vector<8x256xf32>
    %c0_3 = arith.constant 0 : index
    %c0_4 = arith.constant 0 : index
    %3 = vector.load %arg3[%c0_3, %c0_4] : memref<1x256xf32, #tpu.memory_space<vmem>>, vector<1x256xf32>
    %4 = vector.broadcast %3 : vector<1x256xf32> to vector<8x256xf32>
    %5 = arith.addf %2, %4 : vector<8x256xf32>
    %cst_5 = arith.constant 0.000000e+00 : f32
    %6 = vector.broadcast %cst_5 : f32 to vector<8x256xf32>
    %7 = arith.maximumf %5, %6 : vector<8x256xf32>
    %c0_6 = arith.constant 0 : index
    %c0_7 = arith.constant 0 : index
    %8 = vector.load %arg4[%c0_6, %c0_7] : memref<256x256xf32, #tpu.memory_space<vmem>>, vector<256x256xf32>
    %cst_8 = arith.constant dense<0.000000e+00> : vector<8x256xf32>
    %9 = tpu.matmul %7, %8, %cst_8 {dimension_numbers = #tpu.dot_dimension_numbers<[1], [0], [0], [1], [0, 0, 1, 1], [], []>} : vector<8x256xf32>, vector<256x256xf32>, vector<8x256xf32> -> vector<8x256xf32>
    %c0_9 = arith.constant 0 : index
    %c0_10 = arith.constant 0 : index
    %10 = vector.load %arg5[%c0_9, %c0_10] : memref<1x256xf32, #tpu.memory_space<vmem>>, vector<1x256xf32>
    %11 = vector.broadcast %10 : vector<1x256xf32> to vector<8x256xf32>
    %12 = arith.addf %9, %11 : vector<8x256xf32>
    %cst_11 = arith.constant 0.000000e+00 : f32
    %13 = vector.broadcast %cst_11 : f32 to vector<8x256xf32>
    %14 = arith.maximumf %12, %13 : vector<8x256xf32>
    %c0_12 = arith.constant 0 : index
    %c0_13 = arith.constant 0 : index
    %15 = vector.load %arg6[%c0_12, %c0_13] : memref<256x128xf32, #tpu.memory_space<vmem>>, vector<256x128xf32>
    %cst_14 = arith.constant dense<0.000000e+00> : vector<8x128xf32>
    %16 = tpu.matmul %14, %15, %cst_14 {dimension_numbers = #tpu.dot_dimension_numbers<[1], [0], [0], [1], [0, 0, 1, 1], [], []>} : vector<8x256xf32>, vector<256x128xf32>, vector<8x128xf32> -> vector<8x128xf32>
    %c0_15 = arith.constant 0 : index
    %c0_16 = arith.constant 0 : index
    %17 = vector.load %arg7[%c0_15, %c0_16] : memref<1x128xf32, #tpu.memory_space<vmem>>, vector<1x128xf32>
    %18 = vector.broadcast %17 : vector<1x128xf32> to vector<8x128xf32>
    %19 = arith.addf %16, %18 : vector<8x128xf32>
    %cst_17 = arith.constant 0.000000e+00 : f32
    %20 = vector.broadcast %cst_17 : f32 to vector<8x128xf32>
    %21 = arith.maximumf %19, %20 : vector<8x128xf32>
    %c0_18 = arith.constant 0 : index
    %c0_19 = arith.constant 0 : index
    %22 = vector.load %arg8[%c0_18, %c0_19] : memref<128x128xf32, #tpu.memory_space<vmem>>, vector<128x128xf32>
    %cst_20 = arith.constant dense<0.000000e+00> : vector<8x128xf32>
    %23 = tpu.matmul %21, %22, %cst_20 {dimension_numbers = #tpu.dot_dimension_numbers<[1], [0], [0], [1], [0, 0, 1, 1], [], []>} : vector<8x128xf32>, vector<128x128xf32>, vector<8x128xf32> -> vector<8x128xf32>
    %c0_21 = arith.constant 0 : index
    %c0_22 = arith.constant 0 : index
    %24 = vector.load %arg9[%c0_21, %c0_22] : memref<1x128xf32, #tpu.memory_space<vmem>>, vector<1x128xf32>
    %25 = vector.broadcast %24 : vector<1x128xf32> to vector<8x128xf32>
    %26 = arith.addf %23, %25 : vector<8x128xf32>
    %c0_23 = arith.constant 0 : index
    %c0_24 = arith.constant 0 : index
    %27 = vector.load %arg10[%c0_23, %c0_24] : memref<8x128xf32, #tpu.memory_space<vmem>>, vector<8x128xf32>
    tpu.vector_store %arg10[%c0_23, %c0_24], %26 {strides = array<i32>} : memref<8x128xf32, #tpu.memory_space<vmem>>, vector<8x128xf32>,
    return
  }
  func.func @transform_0(%arg0: i32) -> (i32, i32) {
    %c0_i32 = arith.constant 0 : i32
    %c0_i32_0 = arith.constant 0 : i32
    return %arg0, %c0_i32 : i32, i32
  }
  func.func @transform_1(%arg0: i32) -> (i32, i32) {
    %c0_i32 = arith.constant 0 : i32
    %c0_i32_0 = arith.constant 0 : i32
    %c0_i32_1 = arith.constant 0 : i32
    return %c0_i32, %c0_i32_0 : i32, i32
  }
  func.func @transform_2(%arg0: i32) -> (i32, i32) {
    %c0_i32 = arith.constant 0 : i32
    %c0_i32_0 = arith.constant 0 : i32
    %c0_i32_1 = arith.constant 0 : i32
    return %c0_i32, %c0_i32_0 : i32, i32
  }
  func.func @transform_3(%arg0: i32) -> (i32, i32) {
    %c0_i32 = arith.constant 0 : i32
    %c0_i32_0 = arith.constant 0 : i32
    %c0_i32_1 = arith.constant 0 : i32
    return %c0_i32, %c0_i32_0 : i32, i32
  }
  func.func @transform_4(%arg0: i32) -> (i32, i32) {
    %c0_i32 = arith.constant 0 : i32
    %c0_i32_0 = arith.constant 0 : i32
    %c0_i32_1 = arith.constant 0 : i32
    return %c0_i32, %c0_i32_0 : i32, i32
  }
  func.func @transform_5(%arg0: i32) -> (i32, i32) {
    %c0_i32 = arith.constant 0 : i32
    %c0_i32_0 = arith.constant 0 : i32
    %c0_i32_1 = arith.constant 0 : i32
    return %c0_i32, %c0_i32_0 : i32, i32
  }
  func.func @transform_6(%arg0: i32) -> (i32, i32) {
    %c0_i32 = arith.constant 0 : i32
    %c0_i32_0 = arith.constant 0 : i32
    %c0_i32_1 = arith.constant 0 : i32
    return %c0_i32, %c0_i32_0 : i32, i32
  }
  func.func @transform_7(%arg0: i32) -> (i32, i32) {
    %c0_i32 = arith.constant 0 : i32
    %c0_i32_0 = arith.constant 0 : i32
    %c0_i32_1 = arith.constant 0 : i32
    return %c0_i32, %c0_i32_0 : i32, i32
  }
  func.func @transform_8(%arg0: i32) -> (i32, i32) {
    %c0_i32 = arith.constant 0 : i32
    %c0_i32_0 = arith.constant 0 : i32
    %c0_i32_1 = arith.constant 0 : i32
    return %c0_i32, %c0_i32_0 : i32, i32
  }
  func.func @transform_9(%arg0: i32) -> (i32, i32) {
    %c0_i32 = arith.constant 0 : i32
    %c0_i32_0 = arith.constant 0 : i32
    return %arg0, %c0_i32 : i32, i32
  }
}

</mosaic_0001>

<bundles_post_ra>
// kernel: net_forward.1
= control target key start
LH: loop header
LB: loop body
LE: loop exit
PB: predicated region body
PF: predicated region fallthrough
CT: control target
= control target key end

     0   :  { %14 = vsyncpa [#allocation3], 0  ;;  %s1495_s0 = inlined_call_operand.vmem [shape: f32[16,5], index: 0, kind: input, shape index: {}]   ;;  %s1496_s1 = inlined_call_operand.vmem [shape: f32[5,256], index: 1, kind: input, shape index: {}]   ;;  %s1497_s2 = inlined_call_operand.vmem [shape: f32[1,256], index: 2, kind: input, shape index: {}]   ;;  %s1498_s3 = inlined_call_operand.hbm [shape: f32[256,256], index: 3, kind: input, shape index: {}]   ;;  %s1499_s4 = inlined_call_operand.vmem [shape: f32[1,256], index: 4, kind: input, shape index: {}]   ;;  %s1500_s5 = inlined_call_operand.hbm [shape: f32[256,128], index: 5, kind: input, shape index: {}]   ;;  %s1501_s6 = inlined_call_operand.vmem [shape: f32[1,128], index: 6, kind: input, shape index: {}]   ;;  %s1502_s7 = inlined_call_operand.hbm [shape: f32[128,128], index: 7, kind: input, shape index: {}]   ;;  %s1503_s8 = inlined_call_operand.vmem [shape: f32[1,128], index: 8, kind: input, shape index: {}]   ;;  %s1504_s9 = inlined_call_operand.vmem [shape: f32[16,128], index: 9, kind: output, shape index: {}]  }
   0x1   :  { %15 = vsyncpa [#allocation5], 0  ;;  %s1341_s30 = smov 0  }
   0x2 LB: > { %s1281_s10 = smov [#allocation4]   ;;  %s1347_s12 = sadd.s32 4294967295, %s1279_s30   ;;  %s1279_s30 = sphi %s1341_s30, %s21_s30  }
   0x3   : > { %s280_s11 = sshll.u32 %s1281_s10, 4  ;;  %p910_p0 = scmp.ge.s32.totalorder %s1279_s30, 1  ;;  %s1356_s11 = int_to_ptr.vmem [resolvable:$true] %s280_s11 }
   0x4   : > { %p246_p1 = scmp.lt.s32.totalorder %s1279_s30, 3  ;;  %p1505_p2 = scmp.eq.s32.totalorder %s1347_s12, 0 }
   0x5   : > { %s1282_s14 = smov [#allocation2]   ;;  %s1283_s17 = smov [#allocation6]  }
   0x6   : > { %p1352_p3 = pnand %p910_p0, %p246_p1  ;;  %s264_s15 = sshll.u32 %s1282_s14, 4  ;;  %s1360_s15 = int_to_ptr.vmem [resolvable:$true] %s264_s15 }
   0x7   : > { %s1368_s18 = sshll.u32 %s1283_s17, 4  ;;  %s1181_s21 = scalar_lea.hbm %s1500_s5, 4096  ;;  %s297_s18 = int_to_ptr.vmem [resolvable:$true] %s1368_s18 }
   0x8   : > { %s1507_s13 = scalar_select %p1352_p3, 1, 0 }
   0x9   : > { %p1147_p4 = pneg %p1352_p3  ;;  %p1182_p6 = scmp.ne.s32.totalorder %s1500_s5, %s1181_s21 }
   0xa   : > { %p1188_p10 = scmp.lt.u32.totalorder %s1181_s21, %s1500_s5 }
   0xb   : > { %p1364_p5 = pnand %p1505_p2, %p1147_p4 }
   0xd   : > { %p1378_p7 = pneg %p1364_p5 }
   0xf   : > { %p1184_p8 = pnand %p1378_p7, %p1182_p6 }
  0x11   : > { %p1185_p9 = pneg %p1184_p8 }
  0x13   : > { %p1190_p11 = pnand %p1188_p10, %p1185_p9 }
  0x15   : > { %1193 = shalt.err (!%p1190_p11)
}
  0x16   : > { %s1194_s27 = scalar_lea.vmem %s1356_s11, 4096  ;;  %p1202_p1 = scmp.lt.s32.totalorder %s1356_s11, %s1356_s11 }
  0x17   : > { %p1195_p12 = scmp.ne.s32.totalorder %s1356_s11, %s1194_s27  ;;  %p1203_p4 = scmp.lt.s32.totalorder %s1194_s27, %s1194_s27 }
  0x19   : > { %p1197_p13 = pnand %p1195_p12, %p1378_p7  ;;  %p1204_p6 = por %p1203_p4, %p1202_p1 }
  0x1b   : > { %p1198_p0 = pneg %p1197_p13 }
  0x1d   : > { %p1205_p8 = pnand %p1204_p6, %p1198_p0 }
  0x1f   : > { %1208 = shalt.err (!%p1205_p8)
}
  0x20   : > { %s1284_s28 = smov 128   ;;  %s1285_s29 = smov 8  }
  0x21   : > { %1153 = dma.hbm_to_vmem [thread:$0]  (!%p1364_p5), %s1500_s5, 4096, %s1356_s11, [#allocation5], %s1284_s28, %s1284_s28, %s1285_s29  }
  0x22   : > { %s1209_s20 = scalar_lea.hbm %s1498_s3, 8192 }
  0x23   : > { %p1210_p9 = scmp.ne.s32.totalorder %s1498_s3, %s1209_s20  ;;  %p1216_p12 = scmp.lt.u32.totalorder %s1209_s20, %s1498_s3 }
  0x25   : > { %p1212_p10 = pnand %p1210_p9, %p1378_p7 }
  0x27   : > { %p1213_p11 = pneg %p1212_p10 }
  0x29   : > { %p1218_p13 = pnand %p1216_p12, %p1213_p11 }
  0x2b   : > { %1221 = shalt.err (!%p1218_p13)
}
  0x2c   : > { %s1222_s11 = scalar_lea.vmem %s1360_s15, 8192  ;;  %p1230_p6 = scmp.lt.s32.totalorder %s1360_s15, %s1360_s15 }
  0x2d   : > { %p1223_p0 = scmp.ne.s32.totalorder %s1360_s15, %s1222_s11  ;;  %p1231_p8 = scmp.lt.s32.totalorder %s1222_s11, %s1222_s11 }
  0x2f   : > { %p1225_p1 = pnand %p1223_p0, %p1378_p7  ;;  %p1232_p9 = por %p1231_p8, %p1230_p6 }
  0x31   : > { %p1226_p4 = pneg %p1225_p1 }
  0x33   : > { %p1233_p10 = pnand %p1232_p9, %p1226_p4 }
  0x35   : > { %1236 = shalt.err (!%p1233_p10)
}
  0x36   : > { %s1286_s26 = smov 256   ;;  %s1287_s27 = smov 16  }
  0x37   : > { %1150 = dma.hbm_to_vmem [thread:$0]  (!%p1364_p5), %s1498_s3, 8192, %s1360_s15, [#allocation3], %s1286_s26, %s1286_s26, %s1287_s27  }
  0x38   : > { %s1237_s20 = scalar_lea.hbm %s1502_s7, 2048 }
  0x39   : > { %p1238_p11 = scmp.ne.s32.totalorder %s1502_s7, %s1237_s20  ;;  %p1244_p0 = scmp.lt.u32.totalorder %s1237_s20, %s1502_s7 }
  0x3b   : > { %p1240_p12 = pnand %p1238_p11, %p1378_p7 }
  0x3d   : > { %p1241_p13 = pneg %p1240_p12 }
  0x3f   : > { %p1246_p1 = pnand %p1244_p0, %p1241_p13 }
  0x41   : > { %1249 = shalt.err (!%p1246_p1)
}
  0x42   : > { %s1250_s11 = scalar_lea.vmem %s297_s18, 2048  ;;  %p1258_p9 = scmp.lt.s32.totalorder %s297_s18, %s297_s18 }
  0x43   : > { %p1251_p4 = scmp.ne.s32.totalorder %s297_s18, %s1250_s11  ;;  %p1259_p10 = scmp.lt.s32.totalorder %s1250_s11, %s1250_s11 }
  0x45   : > { %p1253_p6 = pnand %p1251_p4, %p1378_p7  ;;  %p1260_p2 = por %p1259_p10, %p1258_p9 }
  0x47   : > { %p1254_p8 = pneg %p1253_p6 }
  0x49   : > { %p1261_p3 = pnand %p1260_p2, %p1254_p8 }
  0x4b   : > { %1264 = shalt.err (!%p1261_p3)
}
  0x4c   : > { %1156 = dma.hbm_to_vmem [thread:$0]  (!%p1364_p5), %s1502_s7, 2048, %s297_s18, [#allocation5], %s1284_s28, %s1284_s28, %s1285_s29  }
  0x4d   : > { %p1510_p11 = scmp.ne.s32.totalorder %s1507_s13, 0 }
  0x4e   : > { %p1511_p7 = scmp.eq.s32.totalorder (!%p1510_p11), %s1347_s12, 0 }
  0x4f   : > { %322 = sbr.rel (%p1510_p11) target bundleno = 966 (0x3c6), region = 56 }
  0x56   : > { %1270 = dma.done.wait (%p1511_p7), [#allocation3], 8192   ;;  %p1512_p12 = pmov %p1511_p7 }
  0x57   : > { %p1513_p2 = pmov %p1511_p7 }
  0x58   : > { %1272 = vsyncadd (%p1512_p12), [#allocation3], 4294959104 }
  0x59   : > { %1274 = dma.done.wait (%p1513_p2), [#allocation5], 6144   ;;  %p1514_p3 = pmov %p1513_p2 }
  0x5a   : > { %p364_p13 = scmp.lt.s32.totalorder %s1347_s12, 1  ;;  %v1288_v0 = vmov 0.0   ;;  %vm391_vm0 = vcmask 1044480   ;;  %v374_v1 = vld [vmem:[%s1496_s1 + $0x8] sm:$0x1f]  ;;  %vm387_vm1 = vcmask 39936  }
  0x5b   : > { %1276 = vsyncadd (%p1514_p3), [#allocation5], 4294961152  ;;  %462 = vmatprep.mubr.f32.mxu0 %v1288_v0  ;;  %v373_v2 = vld [vmem:[%s1496_s1] sm:$0x1f]  ;;  %921 = vmatprep.subr.msk.mxu0 %vm391_vm0, %v374_v1  ;;  %v472_v4 = vld [vmem:[#allocation2 + $0x8] sm:$0xff]  ;;  %vm1290_vm2 = vmmov 0  }
  0x5c   : > { %s1516_s12 = smov (!%p364_p13, %s1347_s12), 1  ;;  %v474_v5 = vld [vmem:[#allocation2 + $0x18] sm:$0xff]  ;;  %v471_v6 = vld [vmem:[#allocation2] sm:$0xff]  ;;  %922 = vmatpush1.msk.msra.mxu0 %vm391_vm0, %v373_v2  ;;  %v473_v8 = vld [vmem:[#allocation2 + $0x10] sm:$0xff] }
  0x5d   : > { %s919_s13 = sshll.u32 %s1516_s12, 3  ;;  %v1015_v7 = vpack.c.bf16 %v474_v5, %v472_v4  ;;  %v476_v9 = vld [vmem:[#allocation2 + $0x28] sm:$0xff]  ;;  %v478_v10 = vld [vmem:[#allocation2 + $0x38] sm:$0xff]  ;;  %v1017_v11 = vpack.c.bf16 %v473_v8, %v471_v6  ;;  %v475_v13 = vld [vmem:[#allocation2 + $0x20] sm:$0xff] }
  0x5e   : > { %s367_s24 = scalar_lea.vmem %s1495_s0, %s919_s13  ;;  %v1019_v12 = vpack.c.bf16 %v478_v10, %v476_v9  ;;  %v477_v14 = vld [vmem:[#allocation2 + $0x30] sm:$0xff]  ;;  %v480_v15 = vld [vmem:[#allocation2 + $0x48] sm:$0xff]  ;;  %v482_v16 = vld [vmem:[#allocation2 + $0x58] sm:$0xff]  ;;  %s371_s26 = scalar_lea.vmem %s1504_s9, %s919_s13 }
  0x5f   : > { %v372_v3 = vld [vmem:[%s367_s24] sm:$0xff]  ;;  %1016 = vmatprep.subr.bf16.mxu1 %v1015_v7  ;;  %v1021_v17 = vpack.c.bf16 %v477_v14, %v475_v13  ;;  %v1023_v18 = vpack.c.bf16 %v482_v16, %v480_v15  ;;  %v479_v19 = vld [vmem:[#allocation2 + $0x40] sm:$0xff]  ;;  %v484_v21 = vld [vmem:[#allocation2 + $0x68] sm:$0xff] }
  0x60   : > { %923 = vmatmul.mubr.msk.f32.vlgmr.msra.gmra.mrb[0].mxu0 %vm387_vm1, %v372_v3  ;;  %1018 = vmatpush1.bf16.msra.mxu1 %v1017_v11  ;;  %v481_v20 = vld [vmem:[#allocation2 + $0x50] sm:$0xff]  ;;  %v486_v22 = vld [vmem:[#allocation2 + $0x78] sm:$0xff]  ;;  %v483_v25 = vld [vmem:[#allocation2 + $0x60] sm:$0xff] }
  0x61   : > { %1020 = vmatprep.subr.bf16.mxu1 %v1019_v12  ;;  %v1025_v23 = vpack.c.bf16 %v481_v20, %v479_v19  ;;  %v1027_v24 = vpack.c.bf16 %v486_v22, %v484_v21  ;;  %v485_v26 = vld [vmem:[#allocation2 + $0x70] sm:$0xff]  ;;  %v488_v27 = vld [vmem:[#allocation2 + $0x88] sm:$0xff]  ;;  %v490_v28 = vld [vmem:[#allocation2 + $0x98] sm:$0xff] }
  0x62   : > { %v1029_v29 = vpack.c.bf16 %v485_v26, %v483_v25  ;;  %v1031_v30 = vpack.c.bf16 %v490_v28, %v488_v27  ;;  %v487_v31 = vld [vmem:[#allocation2 + $0x80] sm:$0xff]  ;;  %v489_v32 = vld [vmem:[#allocation2 + $0x90] sm:$0xff]  ;;  %v492_v33 = vld [vmem:[#allocation2 + $0xa8] sm:$0xff] }
  0x63   : > { %v494_v34 = vld [vmem:[#allocation2 + $0xb8] sm:$0xff]  ;;  %v1033_v35 = vpack.c.bf16 %v489_v32, %v487_v31  ;;  %v491_v37 = vld [vmem:[#allocation2 + $0xa0] sm:$0xff]  ;;  %v493_v38 = vld [vmem:[#allocation2 + $0xb0] sm:$0xff] }
  0x64   : > { %1022 = vmatpush1.bf16.msra.mxu1 %v1021_v17  ;;  %v1035_v36 = vpack.c.bf16 %v494_v34, %v492_v33  ;;  %v496_v39 = vld [vmem:[#allocation2 + $0xc8] sm:$0xff]  ;;  %v498_v40 = vld [vmem:[#allocation2 + $0xd8] sm:$0xff]  ;;  %v1037_v41 = vpack.c.bf16 %v493_v38, %v491_v37  ;;  %v495_v43 = vld [vmem:[#allocation2 + $0xc0] sm:$0xff] }
  0x65   : > { %1024 = vmatprep.subr.bf16.mxu1 %v1023_v18  ;;  %v1039_v42 = vpack.c.bf16 %v498_v40, %v496_v39  ;;  %v497_v44 = vld [vmem:[#allocation2 + $0xd0] sm:$0xff]  ;;  %v500_v45 = vld [vmem:[#allocation2 + $0xe8] sm:$0xff]  ;;  %v502_v46 = vld [vmem:[#allocation2 + $0xf8] sm:$0xff] }
  0x66   : > { %v1041_v47 = vpack.c.bf16 %v497_v44, %v495_v43  ;;  %v1043_v48 = vpack.c.bf16 %v502_v46, %v500_v45  ;;  %v499_v49 = vld [vmem:[#allocation2 + $0xe0] sm:$0xff]  ;;  %v501_v50 = vld [vmem:[#allocation2 + $0xf0] sm:$0xff]  ;;  %v504_v51 = vld [vmem:[#allocation2 + $0x108] sm:$0xff] }
  0x67   : > { %v506_v52 = vld [vmem:[#allocation2 + $0x118] sm:$0xff]  ;;  %v1045_v53 = vpack.c.bf16 %v501_v50, %v499_v49  ;;  %v503_v55 = vld [vmem:[#allocation2 + $0x100] sm:$0xff]  ;;  %v505_v56 = vld [vmem:[#allocation2 + $0x110] sm:$0xff] }
  0x68   : > { %1026 = vmatpush1.bf16.msra.mxu1 %v1025_v23  ;;  %v1047_v54 = vpack.c.bf16 %v506_v52, %v504_v51  ;;  %v508_v57 = vld [vmem:[#allocation2 + $0x128] sm:$0xff]  ;;  %v510_v58 = vld [vmem:[#allocation2 + $0x138] sm:$0xff]  ;;  %v1049_v59 = vpack.c.bf16 %v505_v56, %v503_v55  ;;  %v507_v61 = vld [vmem:[#allocation2 + $0x120] sm:$0xff] }
  0x69   : > { %1028 = vmatprep.subr.bf16.mxu1 %v1027_v24  ;;  %v1051_v60 = vpack.c.bf16 %v510_v58, %v508_v57  ;;  %v509_v62 = vld [vmem:[#allocation2 + $0x130] sm:$0xff]  ;;  %v512_v63 = vld [vmem:[#allocation2 + $0x148] sm:$0xff]  ;;  %v514_v1 = vld [vmem:[#allocation2 + $0x158] sm:$0xff] }
  0x6a   : > { %v1053_v2 = vpack.c.bf16 %v509_v62, %v507_v61  ;;  %v1055_v3 = vpack.c.bf16 %v514_v1, %v512_v63  ;;  %v511_v4 = vld [vmem:[#allocation2 + $0x140] sm:$0xff]  ;;  %v513_v5 = vld [vmem:[#allocation2 + $0x150] sm:$0xff]  ;;  %v516_v6 = vld [vmem:[#allocation2 + $0x168] sm:$0xff] }
  0x6b   : > { %v518_v7 = vld [vmem:[#allocation2 + $0x178] sm:$0xff]  ;;  %v1057_v8 = vpack.c.bf16 %v513_v5, %v511_v4  ;;  %v515_v10 = vld [vmem:[#allocation2 + $0x160] sm:$0xff]  ;;  %v517_v11 = vld [vmem:[#allocation2 + $0x170] sm:$0xff] }
  0x6c   : > { %1030 = vmatpush1.bf16.msra.mxu1 %v1029_v29  ;;  %v1059_v9 = vpack.c.bf16 %v518_v7, %v516_v6  ;;  %v520_v12 = vld [vmem:[#allocation2 + $0x188] sm:$0xff]  ;;  %v522_v13 = vld [vmem:[#allocation2 + $0x198] sm:$0xff]  ;;  %v1061_v14 = vpack.c.bf16 %v517_v11, %v515_v10  ;;  %v519_v16 = vld [vmem:[#allocation2 + $0x180] sm:$0xff] }
  0x6d   : > { %1032 = vmatprep.subr.bf16.mxu1 %v1031_v30  ;;  %v1063_v15 = vpack.c.bf16 %v522_v13, %v520_v12  ;;  %v521_v17 = vld [vmem:[#allocation2 + $0x190] sm:$0xff]  ;;  %v524_v18 = vld [vmem:[#allocation2 + $0x1a8] sm:$0xff]  ;;  %v526_v19 = vld [vmem:[#allocation2 + $0x1b8] sm:$0xff]  ;;  %v377_v13 = vlaneseq }
  0x6e   : > { %v1065_v20 = vpack.c.bf16 %v521_v17, %v519_v16  ;;  %v1067_v21 = vpack.c.bf16 %v526_v19, %v524_v18  ;;  %v523_v22 = vld [vmem:[#allocation2 + $0x1a0] sm:$0xff]  ;;  %v525_v23 = vld [vmem:[#allocation2 + $0x1b0] sm:$0xff]  ;;  %v528_v24 = vld [vmem:[#allocation2 + $0x1c8] sm:$0xff] }
  0x6f   : > { %v530_v25 = vld [vmem:[#allocation2 + $0x1d8] sm:$0xff]  ;;  %v1069_v26 = vpack.c.bf16 %v525_v23, %v523_v22  ;;  %v527_v28 = vld [vmem:[#allocation2 + $0x1c0] sm:$0xff]  ;;  %v529_v29 = vld [vmem:[#allocation2 + $0x1d0] sm:$0xff] }
  0x70   : > { %1034 = vmatpush1.bf16.msra.mxu1 %v1033_v35  ;;  %v1071_v27 = vpack.c.bf16 %v530_v25, %v528_v24  ;;  %v1073_v30 = vpack.c.bf16 %v529_v29, %v527_v28  ;;  %v532_v31 = vld [vmem:[#allocation2 + $0x1e8] sm:$0xff]  ;;  %v534_v32 = vld [vmem:[#allocation2 + $0x1f8] sm:$0xff]  ;;  %v531_v34 = vld [vmem:[#allocation2 + $0x1e0] sm:$0xff] }
  0x71   : > { %1036 = vmatprep.subr.bf16.mxu1 %v1035_v36  ;;  %v1075_v33 = vpack.c.bf16 %v534_v32, %v532_v31  ;;  %v533_v35 = vld [vmem:[#allocation2 + $0x1f0] sm:$0xff]  ;;  %v636_v37 = vld [vmem:[#allocation4 + $0x80] sm:$0xff]  ;;  %v637_v38 = vld [vmem:[#allocation4 + $0x88] sm:$0xff] }
  0x72   : > { %v1077_v36 = vpack.c.bf16 %v533_v35, %v531_v34  ;;  %v620_v39 = vld [vmem:[#allocation4] sm:$0xff]  ;;  %v1079_v40 = vpack.c.bf16 %v637_v38, %v636_v37  ;;  %v639_v43 = vld [vmem:[#allocation4 + $0x98] sm:$0xff]  ;;  %v622_v46 = vld [vmem:[#allocation4 + $0x10] sm:$0xff]  ;;  %v1289_v35 = vmov 0.0|0.0  }
  0x73   : > { %v641_v49 = vld [vmem:[#allocation4 + $0xa8] sm:$0xff]  ;;  %v624_v52 = vld [vmem:[#allocation4 + $0x20] sm:$0xff]  ;;  %v643_v55 = vld [vmem:[#allocation4 + $0xb8] sm:$0xff] }
  0x74   : > { %1038 = vmatpush1.bf16.msra.mxu1 %v1037_v41  ;;  %v621_v41 = vld [vmem:[#allocation4 + $0x8] sm:$0xff]  ;;  %1080 = vmatprep.subr.bf16.mxu0 %v1079_v40  ;;  %v626_v58 = vld [vmem:[#allocation4 + $0x30] sm:$0xff]  ;;  %v628_v1 = vld [vmem:[#allocation4 + $0x40] sm:$0xff] }
  0x75   : > { %1040 = vmatprep.subr.bf16.mxu1 %v1039_v42  ;;  %v638_v42 = vld [vmem:[#allocation4 + $0x90] sm:$0xff]  ;;  %v1081_v44 = vpack.c.bf16 %v621_v41, %v620_v39  ;;  %v645_v61 = vld [vmem:[#allocation4 + $0xc8] sm:$0xff]  ;;  %v647_v4 = vld [vmem:[#allocation4 + $0xd8] sm:$0xff] }
  0x76   : > { %v1083_v45 = vpack.c.bf16 %v639_v43, %v638_v42  ;;  %v630_v7 = vld [vmem:[#allocation4 + $0x50] sm:$0xff]  ;;  %v649_v10 = vld [vmem:[#allocation4 + $0xe8] sm:$0xff]  ;;  %v730_v42 = vld [vmem:[#allocation6] sm:$0xff] }
  0x77   : > { %1082 = vmatpush3.bf16.msra.mxu0 %v1081_v44  ;;  %v375_v16 = vld [vmem:[%s1497_s2] sm:$0x3]  ;;  %v731_v43 = vld [vmem:[#allocation6 + $0x8] sm:$0xff] }
  0x78   : > { %1042 = vmatpush1.bf16.msra.mxu1 %v1041_v47  ;;  %v623_v47 = vld [vmem:[#allocation4 + $0x18] sm:$0xff]  ;;  %1084 = vmatprep.subr.bf16.mxu0 %v1083_v45  ;;  %v650_v29 = vld [vmem:[#allocation4 + $0xf0] sm:$0xff] }
  0x79   : > { %1044 = vmatprep.subr.bf16.mxu1 %v1043_v48  ;;  %v640_v48 = vld [vmem:[#allocation4 + $0xa0] sm:$0xff]  ;;  %v1085_v50 = vpack.c.bf16 %v623_v47, %v622_v46  ;;  %v634_v32 = vld [vmem:[#allocation4 + $0x70] sm:$0xff]  ;;  %v1112_v46 = vpack.c.bf16 %v731_v43, %v730_v42 }
  0x7a   : > { %v1087_v51 = vpack.c.bf16 %v641_v49, %v640_v48  ;;  %v732_v48 = vld [vmem:[#allocation6 + $0x10] sm:$0xff]  ;;  %v733_v49 = vld [vmem:[#allocation6 + $0x18] sm:$0xff] }
  0x7b   : > { %1086 = vmatpush3.bf16.msra.mxu0 %v1085_v50  ;;  %v1115_v50 = vpack.c.bf16 %v733_v49, %v732_v48 }
  0x7c   : > { %1046 = vmatpush1.bf16.msra.mxu1 %v1045_v53  ;;  %v625_v53 = vld [vmem:[#allocation4 + $0x28] sm:$0xff]  ;;  %1088 = vmatprep.subr.bf16.mxu0 %v1087_v51  ;;  %v734_v51 = vld [vmem:[#allocation6 + $0x20] sm:$0xff] }
  0x7d   : > { %1048 = vmatprep.subr.bf16.mxu1 %v1047_v54  ;;  %v642_v54 = vld [vmem:[#allocation4 + $0xb0] sm:$0xff]  ;;  %v1089_v56 = vpack.c.bf16 %v625_v53, %v624_v52  ;;  %v735_v52 = vld [vmem:[#allocation6 + $0x28] sm:$0xff] }
  0x7e   : > { %v1091_v57 = vpack.c.bf16 %v643_v55, %v642_v54  ;;  %v1118_v53 = vpack.c.bf16 %v735_v52, %v734_v51  ;;  %v736_v54 = vld [vmem:[#allocation6 + $0x30] sm:$0xff]  ;;  %v737_v55 = vld [vmem:[#allocation6 + $0x38] sm:$0xff] }
  0x7f   : > { %1090 = vmatpush3.bf16.msra.mxu0 %v1089_v56  ;;  %v1121_v56 = vpack.c.bf16 %v737_v55, %v736_v54 }
  0x80   : > { %1050 = vmatpush1.bf16.msra.mxu1 %v1049_v59  ;;  %v627_v59 = vld [vmem:[#allocation4 + $0x38] sm:$0xff]  ;;  %1092 = vmatprep.subr.bf16.mxu0 %v1091_v57  ;;  %v738_v57 = vld [vmem:[#allocation6 + $0x40] sm:$0xff] }
  0x81   : > { %1052 = vmatprep.subr.bf16.mxu1 %v1051_v60  ;;  %v644_v60 = vld [vmem:[#allocation4 + $0xc0] sm:$0xff]  ;;  %v1093_v62 = vpack.c.bf16 %v627_v59, %v626_v58  ;;  %v739_v58 = vld [vmem:[#allocation6 + $0x48] sm:$0xff] }
  0x82   : > { %v1095_v63 = vpack.c.bf16 %v645_v61, %v644_v60  ;;  %v1124_v59 = vpack.c.bf16 %v739_v58, %v738_v57  ;;  %v740_v60 = vld [vmem:[#allocation6 + $0x50] sm:$0xff]  ;;  %v741_v61 = vld [vmem:[#allocation6 + $0x58] sm:$0xff] }
  0x83   : > { %1094 = vmatpush3.bf16.msra.mxu0 %v1093_v62  ;;  %v1127_v62 = vpack.c.bf16 %v741_v61, %v740_v60 }
  0x84   : > { %1054 = vmatpush1.bf16.msra.mxu1 %v1053_v2  ;;  %v629_v2 = vld [vmem:[#allocation4 + $0x48] sm:$0xff]  ;;  %1096 = vmatprep.subr.bf16.mxu0 %v1095_v63  ;;  %v742_v63 = vld [vmem:[#allocation6 + $0x60] sm:$0xff] }
  0x85   : > { %1056 = vmatprep.subr.bf16.mxu1 %v1055_v3  ;;  %v646_v3 = vld [vmem:[#allocation4 + $0xd0] sm:$0xff]  ;;  %v1097_v5 = vpack.c.bf16 %v629_v2, %v628_v1  ;;  %v743_v1 = vld [vmem:[#allocation6 + $0x68] sm:$0xff] }
  0x86   : > { %v1099_v6 = vpack.c.bf16 %v647_v4, %v646_v3  ;;  %v1130_v2 = vpack.c.bf16 %v743_v1, %v742_v63  ;;  %v744_v3 = vld [vmem:[#allocation6 + $0x70] sm:$0xff]  ;;  %v745_v4 = vld [vmem:[#allocation6 + $0x78] sm:$0xff] }
  0x87   : > { %1098 = vmatpush3.bf16.msra.mxu0 %v1097_v5  ;;  %v1133_v5 = vpack.c.bf16 %v745_v4, %v744_v3 }
  0x88   : > { %1058 = vmatpush1.bf16.msra.mxu1 %v1057_v8  ;;  %v631_v8 = vld [vmem:[#allocation4 + $0x58] sm:$0xff]  ;;  %1100 = vmatprep.subr.bf16.mxu0 %v1099_v6 }
  0x89   : > { %1060 = vmatprep.subr.bf16.mxu1 %v1059_v9  ;;  %v648_v9 = vld [vmem:[#allocation4 + $0xe0] sm:$0xff]  ;;  %v1101_v11 = vpack.c.bf16 %v631_v8, %v630_v7  ;;  %v924_v7 = vld [vmem:[%s1501_s6] ss:$0 sm:$0xff] }
  0x8a   : > { %v1103_v12 = vpack.c.bf16 %v649_v10, %v648_v9 }
  0x8b   : > { %1102 = vmatpush3.bf16.msra.mxu0 %v1101_v11 }
  0x8c   : > { %1062 = vmatpush1.bf16.msra.mxu1 %v1061_v14  ;;  %1104 = vmatprep.subr.bf16.mxu0 %v1103_v12  ;;  %v378_v14 = vshrl.u32 %v377_v13, 7  ;;  %v925_v12 = vld [vmem:[%s1503_s8] ss:$0 sm:$0xff] }
  0x8d   : > { %1064 = vmatprep.subr.bf16.mxu1 %v1063_v15 }
  0x8e   : > { %v379_v15 = vsub.s32 0, %v378_v14  ;;  %v383_v17 = vsub.s32 1, %v378_v14 }
  0x90   : > { %1066 = vmatpush1.bf16.msra.mxu1 %v1065_v20  ;;  %v380_v18 = vrot.slane %v375_v16, %v379_v15  ;;  %v384_v19 = vrot.slane %v375_v16, %v383_v17 }
  0x91   : > { %1068 = vmatprep.subr.bf16.mxu1 %v1067_v21 }
  0x94   : > { %1070 = vmatpush1.bf16.msra.mxu1 %v1069_v26  ;;  %v632_v26 = vld [vmem:[#allocation4 + $0x60] sm:$0xff] }
  0x95   : > { %1072 = vmatprep.subr.bf16.mxu1 %v1071_v27  ;;  %v633_v27 = vld [vmem:[#allocation4 + $0x68] sm:$0xff] }
  0x96   : > { %v1105_v28 = vpack.c.bf16 %v633_v27, %v632_v26 }
  0x98   : > { %1074 = vmatpush1.bf16.msra.mxu1 %v1073_v30  ;;  %1106 = vmatpush3.bf16.msra.mxu0 %v1105_v28  ;;  %v651_v30 = vld [vmem:[#allocation4 + $0xf8] sm:$0xff] }
  0x99   : > { %1076 = vmatprep.subr.bf16.mxu1 %v1075_v33  ;;  %v1107_v31 = vpack.c.bf16 %v651_v30, %v650_v29  ;;  %v635_v33 = vld [vmem:[#allocation4 + $0x78] sm:$0xff] }
  0x9a   : > { %v1109_v34 = vpack.c.bf16 %v635_v33, %v634_v32 }
  0x9b   : > { %1108 = vmatprep.subr.bf16.mxu0 %v1107_v31 }
  0x9c   : > { %1078 = vmatpush1.bf16.msra.mxu1 %v1077_v36  ;;  %1110 = vmatpush3.bf16.msra.mxu0 %v1109_v34  ;;  %v535_v36 = vld [vmem:[%s1499_s4] sm:$0x3] }
  0x9d   : > { %1111 = vmatprep.subr.bf16.mxu0 %v1289_v35  ;;  %v540_v37 = vrot.slane %v535_v36, %v379_v15  ;;  %v544_v38 = vrot.slane %v535_v36, %v383_v17 }
 0x133   : > { %v464_v20 = vpop.f32.mrb[0].mxu0 }
 0x134   : > { %v465_v21 = vadd.f32 %v464_v20, %v380_v18  ;;  %v466_v22 = vpop.f32.mrb[1].mxu0 }
 0x135   : > { %v467_v23 = vadd.f32 %v466_v22, %v384_v19 }
 0x136   : > { %v469_v25 = vmax.f32 %v465_v21, 0.0 }
 0x137   : > { %v470_v24 = vmax.f32 %v467_v23, 0.0 }
 0x139   : > { %611 = vmatprep.mubr.f32.mxu1 %v470_v24 }
 0x13a   : > { %612 = vmatmul.mubr.f32.vlgmr.msra.gmra.mrb[0].mxu1 %v469_v25 }
 0x20d   : > { %v613_v39 = vpop.f32.mrb[0].mxu1 }
 0x20e   : > { %v614_v40 = vadd.f32 %v613_v39, %v540_v37  ;;  %v615_v41 = vpop.f32.mrb[1].mxu1 }
 0x20f   : > { %v616_v44 = vadd.f32 %v615_v41, %v544_v38 }
 0x210   : > { %v618_v47 = vmax.f32 %v614_v40, 0.0 }
 0x211   : > { %v619_v45 = vmax.f32 %v616_v44, 0.0 }
 0x213   : > { %723 = vmatprep.mubr.f32.mxu0 %v619_v45 }
 0x214   : > { %724 = vmatmul.mubr.f32.vlgmr.msra.gmra.mrb[2].mxu0 %v618_v47 }
 0x215   : > { %1113 = vmatpush3.bf16.msra.mxu0 %v1112_v46  ;;  %1012 = vmatprep.mubr.msk.f32.mxu0 %vm1290_vm2, %v1288_v0 }
 0x216   : > { %1114 = vmatprep.subr.bf16.mxu0 %v1289_v35 }
 0x219   : > { %1116 = vmatpush3.bf16.msra.mxu0 %v1115_v50 }
 0x21a   : > { %1117 = vmatprep.subr.bf16.mxu0 %v1289_v35 }
 0x21d   : > { %1119 = vmatpush3.bf16.msra.mxu0 %v1118_v53 }
 0x21e   : > { %1120 = vmatprep.subr.bf16.mxu0 %v1289_v35 }
 0x221   : > { %1122 = vmatpush3.bf16.msra.mxu0 %v1121_v56 }
 0x222   : > { %1123 = vmatprep.subr.bf16.mxu0 %v1289_v35 }
 0x225   : > { %1125 = vmatpush3.bf16.msra.mxu0 %v1124_v59 }
 0x226   : > { %1126 = vmatprep.subr.bf16.mxu0 %v1289_v35 }
 0x229   : > { %1128 = vmatpush3.bf16.msra.mxu0 %v1127_v62 }
 0x22a   : > { %1129 = vmatprep.subr.bf16.mxu0 %v1289_v35 }
 0x22d   : > { %1131 = vmatpush3.bf16.msra.mxu0 %v1130_v2 }
 0x22e   : > { %1132 = vmatprep.subr.bf16.mxu0 %v1289_v35 }
 0x231   : > { %1134 = vmatpush3.bf16.msra.mxu0 %v1133_v5 }
 0x2e7   : > { %v960_v6 = vpop.f32.mrb[2].mxu0 }
 0x2e8   : > { %v961_v8 = vpop.f32.mrb[3].mxu0 }
 0x2e9   : > { %v962_v9 = vadd.f32 %v961_v8, %v960_v6 }
 0x2eb   : > { %v726_v10 = vadd.f32 %v962_v9, %v924_v7 }
 0x2ed   : > { %v729_v11 = vmax.f32 %v726_v10, 0.0 }
 0x2ef   : > { %1013 = vmatmul.mubr.f32.vlgmr.msra.gmra.mrb[4].mxu0 %v729_v11 }
 0x3c2   : > { %v819_v0 = vpop.f32.mrb[4].mxu0 }
 0x3c3   : > { %v820_v13 = vadd.f32 %v925_v12, %v819_v0  ;;  %v1014_v14 = vpop.f32.mrb[5].mxu0 }
 0x3c5   : > { %823 = vst [vmem:[%s371_s26] sm:$0xff] %v820_v13 }
 0x3c6 PF: > { %s21_s30 = sadd.s32 1, %s1279_s30  }
 0x3c7   : > { %p18_p5 = scmp.ge.s32.totalorder %s21_s30, 4  }
 0x3c9   :  { %20 = sbr.rel (!%p18_p5) target bundleno = 2 (0x2), region = 99 }
 0x3d0   :  { %843 = vsyncpa [#allocation3], 1 }
 0x3d1   :  { %845 = vsyncpa [#allocation3 + $0x1], 1 }
 0x3d2   :  { %846 = vsyncpa [#allocation5], 1 }

</bundles_post_ra>
